<compile_context>
chip_gen: v7x
topology: tpu7x:2x2x1
jax: 0.10.0
libtpu: 0.0.40
codegen_flags: <defaults>
</compile_context>

<pallas_src>
import functools

import jax
import jax.numpy as jnp
from jax import lax
from jax.experimental import pallas as pl
from jax.experimental.pallas import tpu as pltpu

GLOVE_DIM = 300  # fixed by the module (en_vectors_web_lg vectors are 300-d)


def _glove_kernel(idx_ref, tab_ref, out_ref, *, vocab, dim, af):
    """One grid step processes a (1, T) tile of token ids.

    idx_ref : VMEM int32 ids                      [1, T]
    tab_ref : VMEM fused table, hi/lo bf16 pieces [2, V, Dtot]
              (columns: [trainable dim | glove 300 | zero pad])
    out_ref : VMEM output slab                    [T, Dtot]
    """
    ids = idx_ref[...]                                   # (1, T) int32
    T = idx_ref.shape[1]

    # One-hot lookup on the MXU: one_hot[v, t] = (ids[t] == v), built in bf16
    # (tokens on the lane axis -> cheap sublane broadcast, half the VMEM of f32).
    iota_v = lax.broadcasted_iota(jnp.int32, (vocab, T), 0)          # (V, T)
    one_hot = (ids == iota_v).astype(jnp.bfloat16)                   # (V, T)

    # Contract over V (transposed-LHS matmul): res[t, d] = table[ids[t], d].
    # Two single-pass bf16 matmuls (hi + lo split) reconstruct the f32 table
    # values to ~4e-6 relative error -- no Precision.HIGHEST 6-pass decompose.
    dn = (((0,), (0,)), ((), ()))
    hi = lax.dot_general(one_hot, tab_ref[0], dn,
                         preferred_element_type=jnp.float32)         # (T, Dtot)
    lo = lax.dot_general(one_hot, tab_ref[1], dn,
                         preferred_element_type=jnp.float32)         # (T, Dtot)
    res = hi + lo

    # Activation only on the trainable columns [0, dim); the boundary need not
    # be lane aligned because we select with a column mask (EUP slot is free).
    if dim > 0 and af:
        col = lax.broadcasted_iota(jnp.int32, res.shape, 1)
        if af == "tanh":
            act = jnp.tanh(res)
        else:  # "relu" (validated in the wrapper)
            act = jnp.maximum(res, 0.0)
        res = jnp.where(col < dim, act, res)

    out_ref[...] = res.astype(out_ref.dtype)


def _ceil_to(x, m):
    return ((x + m - 1) // m) * m


def glove_forward(x, glove_w, emb_w=None, *, af="tanh",
                  max_tokens_per_step=1024, out_dtype=jnp.float32,
                  col_align=128):
    """Pallas implementation of Glove.forward.

    x       : int ids [B, S]
    glove_w : frozen glove table [V, 300] (f32)
    emb_w   : trainable table [V, dim] (f32) or None (dim=0, glove-only path)
    """
    B, S = x.shape
    V, gdim = glove_w.shape
    assert gdim == GLOVE_DIM
    if emb_w is None:
        dim = 0
    else:
        assert emb_w.shape[0] == V
        dim = int(emb_w.shape[1])
    if af and af not in ("tanh", "relu"):
        raise ValueError(f"unsupported activation: {af!r}")

    D_valid = dim + GLOVE_DIM
    Dtot = _ceil_to(D_valid, col_align)       # lane-dense output columns

    # ---- fused, column-padded table; split into exact-ish bf16 hi/lo pieces.
    parts = []
    if dim:
        parts.append(emb_w.astype(jnp.float32))
    parts.append(glove_w.astype(jnp.float32))
    fused = parts[0] if len(parts) == 1 else jnp.concatenate(parts, axis=-1)
    fused = jnp.pad(fused, ((0, 0), (0, Dtot - D_valid)))            # (V, Dtot)
    hi = fused.astype(jnp.bfloat16)
    lo = (fused - hi.astype(jnp.float32)).astype(jnp.bfloat16)
    tables = jnp.stack([hi, lo], axis=0)                             # (2, V, Dtot)

    table_bytes = 2 * V * Dtot * 2            # single-buffered (Buffered(1))
    if table_bytes > (24 << 20):
        # TODO(synk): for large vocabularies switch to an HBM-resident table
        # (memory_space=pl.ANY) with scalar-prefetched ids and double-buffered
        # make_async_copy row gathers instead of the VMEM one-hot MXU lookup.
        raise NotImplementedError("vocab too large for the VMEM one-hot path")

    # ---- token tile size: multiple of 128 lanes, capped by a per-token VMEM
    # estimate that *includes* the (V, T) one-hot temporary.
    out_bytes = jnp.dtype(out_dtype).itemsize
    per_tok = (V * 2                      # (V, T) bf16 one-hot column
               + 3 * Dtot * 4             # f32 matmul/activation temporaries
               + 2 * Dtot * out_bytes     # double-buffered output block
               + 2 * 4)                   # double-buffered id block
    work_budget = 28 << 20
    N = B * S
    tps_cap = max(128, (work_budget // per_tok) // 128 * 128)
    tps = min(max_tokens_per_step, tps_cap, _ceil_to(N, 128))
    tps = max(128, (tps // 128) * 128)
    N_pad = _ceil_to(N, tps)
    num_steps = N_pad // tps

    ids = jnp.clip(x.reshape(-1).astype(jnp.int32), 0, V - 1)  # guard OOB ids
    ids = jnp.pad(ids, (0, N_pad - N))                          # pad -> id 0 (padding row)
    ids = ids.reshape(num_steps, tps)

    # ---- VMEM budget: tables (x1) + working set + headroom, capped at ~85%
    # of physical VMEM (leave room for Mosaic internal scratch on v7x).
    need = table_bytes + tps * per_tok + (4 << 20)
    try:
        phys = pltpu.get_tpu_info().vmem_capacity_bytes
    except Exception:
        phys = 64 << 20                    # assume the smallest (v7x per-TC)
    vmem_limit = min(max(need, 16 << 20), int(phys * 0.85))

    kernel = functools.partial(_glove_kernel, vocab=V, dim=dim, af=af or "")

    out = pl.pallas_call(
        kernel,
        out_shape=jax.ShapeDtypeStruct((N_pad, Dtot), out_dtype),
        grid=(num_steps,),
        in_specs=[
            pl.BlockSpec((1, tps), lambda i: (i, 0)),                # ids tile
            pl.BlockSpec((2, V, Dtot), lambda i: (0, 0, 0),          # whole fused table,
                         pipeline_mode=pl.Buffered(1)),              # single-buffered
        ],
        out_specs=pl.BlockSpec((tps, Dtot), lambda i: (i, 0)),       # lane-dense slab
        compiler_params=pltpu.CompilerParams(
            dimension_semantics=("parallel",),   # independent tiles -> dual-TC on v7x
            vmem_limit_bytes=vmem_limit,
        ),
    )(ids, tables)

    out = out[:N, :D_valid]                   # strip token + column padding (slice only)
    return out.reshape(B, S, D_valid)


def reference_forward(x, glove_w, emb_w, af="tanh"):
    """Pure-JAX reference mirroring the PyTorch forward."""
    glv = glove_w[x]
    if emb_w is None:
        return glv
    raw = emb_w[x]
    if af == "tanh":
        raw = jnp.tanh(raw)
    elif af == "relu":
        raw = jnp.maximum(raw, 0.0)
    return jnp.concatenate([raw, glv], axis=-1)


if __name__ == "__main__":
    key = jax.random.PRNGKey(0)
    k_glove, k_emb, k_x = jax.random.split(key, 3)

    vocab = 32          # len(vocab_list)
    dim = 32            # trainable embedding dim (module default 300; small here)
    B, S = 2, 8

    # Deterministic synthetic "glove" table (stands in for spacy-loaded vectors).
    glove_w = jax.random.normal(k_glove, (vocab, GLOVE_DIM), dtype=jnp.float32)
    # Trainable embedding: nn.Embedding init with padding_idx=0 -> row 0 is zero.
    emb_w = jax.random.normal(k_emb, (vocab, dim), dtype=jnp.float32)
    emb_w = emb_w.at[0].set(0.0)

    x = jax.random.randint(k_x, (B, S), 0, vocab, dtype=jnp.int32)

    out = jax.block_until_ready(glove_forward(x, glove_w, emb_w))

    ref = reference_forward(x, glove_w, emb_w)
    assert out.shape == (B, S, dim + GLOVE_DIM)
    # hi/lo bf16 split reconstructs the f32 table to ~4e-6 relative error.
    assert jnp.allclose(out, ref, atol=1e-4, rtol=1e-4), float(
        jnp.max(jnp.abs(out - ref)))

    print("KERNEL_OK")
</pallas_src>

<mosaic_0001>
module attributes {stable_mosaic.version = 11 : i64} {
  func.func @_glove_kernel(%arg0: i32, %arg1: memref<1x128xi32, #tpu.memory_space<vmem>>, %arg2: memref<2x32x384xbf16, #tpu.memory_space<vmem>>, %arg3: memref<128x384xf32, #tpu.memory_space<vmem>>) attributes {dimension_semantics = [#tpu.dimension_semantics<parallel>], iteration_bounds = array<i64: 1>, scalar_prefetch = 0 : i64, scratch_operands = 0 : i64, tpu.core_type = #tpu.core_type<tc>, window_params = [{transform_indices = @transform_0, window_bounds = array<i64: 1, 128>}, {pipeline_mode = #tpu.pipeline_mode<synchronous>, transform_indices = @transform_1, window_bounds = array<i64: 2, 32, 384>}, {transform_indices = @transform_2, window_bounds = array<i64: 128, 384>}]} {
    %c0 = arith.constant 0 : index
    %c0_0 = arith.constant 0 : index
    %0 = vector.load %arg1[%c0, %c0_0] : memref<1x128xi32, #tpu.memory_space<vmem>>, vector<1x128xi32>
    %1 = tpu.iota {dimensions = array<i32: 0>} : vector<32x128xi32>
    %2 = vector.broadcast %0 : vector<1x128xi32> to vector<32x128xi32>
    %3 = arith.cmpi eq, %2, %1 : vector<32x128xi32>
    %4 = arith.extui %3 : vector<32x128xi1> to vector<32x128xi32>
    %5 = arith.sitofp %4 : vector<32x128xi32> to vector<32x128xf32>
    %6 = arith.truncf %5 : vector<32x128xf32> to vector<32x128xbf16>
    %c0_1 = arith.constant 0 : index
    %c0_2 = arith.constant 0 : index
    %c0_3 = arith.constant 0 : index
    %7 = vector.load %arg2[%c0_1, %c0_2, %c0_3] : memref<2x32x384xbf16, #tpu.memory_space<vmem>>, vector<1x32x384xbf16>
    %8 = vector.shape_cast %7 : vector<1x32x384xbf16> to vector<32x384xbf16>
    %cst = arith.constant dense<0.000000e+00> : vector<128x384xf32>
    %9 = tpu.matmul %6, %8, %cst {dimension_numbers = #tpu.dot_dimension_numbers<[0], [0], [1], [1], [0, 1, 1, 1], [], []>} : vector<32x128xbf16>, vector<32x384xbf16>, vector<128x384xf32> -> vector<128x384xf32>
    %c1 = arith.constant 1 : index
    %c0_4 = arith.constant 0 : index
    %c0_5 = arith.constant 0 : index
    %10 = vector.load %arg2[%c1, %c0_4, %c0_5] : memref<2x32x384xbf16, #tpu.memory_space<vmem>>, vector<1x32x384xbf16>
    %11 = vector.shape_cast %10 : vector<1x32x384xbf16> to vector<32x384xbf16>
    %cst_6 = arith.constant dense<0.000000e+00> : vector<128x384xf32>
    %12 = tpu.matmul %6, %11, %cst_6 {dimension_numbers = #tpu.dot_dimension_numbers<[0], [0], [1], [1], [0, 1, 1, 1], [], []>} : vector<32x128xbf16>, vector<32x384xbf16>, vector<128x384xf32> -> vector<128x384xf32>
    %13 = arith.addf %9, %12 : vector<128x384xf32>
    %14 = tpu.iota {dimensions = array<i32: 1>} : vector<128x384xi32>
    %15 = math.tanh %13 : vector<128x384xf32>
    %c32_i32 = arith.constant 32 : i32
    %16 = vector.broadcast %c32_i32 : i32 to vector<128x384xi32>
    %17 = arith.cmpi slt, %14, %16 : vector<128x384xi32>
    %18 = arith.select %17, %15, %13 : vector<128x384xi1>, vector<128x384xf32>
    %c0_7 = arith.constant 0 : index
    %c0_8 = arith.constant 0 : index
    %19 = vector.load %arg3[%c0_7, %c0_8] : memref<128x384xf32, #tpu.memory_space<vmem>>, vector<128x384xf32>
    tpu.vector_store %arg3[%c0_7, %c0_8], %18 {strides = array<i32>} : memref<128x384xf32, #tpu.memory_space<vmem>>, vector<128x384xf32>,
    return
  }
  func.func @transform_0(%arg0: i32) -> (i32, i32) {
    %c0_i32 = arith.constant 0 : i32
    %c0_i32_0 = arith.constant 0 : i32
    return %arg0, %c0_i32 : i32, i32
  }
  func.func @transform_1(%arg0: i32) -> (i32, i32, i32) {
    %c0_i32 = arith.constant 0 : i32
    %c0_i32_0 = arith.constant 0 : i32
    %c0_i32_1 = arith.constant 0 : i32
    %c0_i32_2 = arith.constant 0 : i32
    return %c0_i32, %c0_i32_0, %c0_i32_1 : i32, i32, i32
  }
  func.func @transform_2(%arg0: i32) -> (i32, i32) {
    %c0_i32 = arith.constant 0 : i32
    %c0_i32_0 = arith.constant 0 : i32
    return %arg0, %c0_i32 : i32, i32
  }
}

</mosaic_0001>

<bundles_post_ra>
// kernel: tpu_custom_call.1
= control target key start
LH: loop header
LB: loop body
LE: loop exit
PB: predicated region body
PF: predicated region fallthrough
CT: control target
= control target key end

     0   :  { %7 = vsyncpa [#allocation3], 0  ;;  %s1264_s0 = inlined_call_operand.hbm [shape: s32[1,128], index: 0, kind: input, shape index: {}]   ;;  %s1265_s1 = inlined_call_operand.hbm [shape: bf16[2,32,384], index: 1, kind: input, shape index: {}]   ;;  %s1266_s2 = inlined_call_operand.hbm [shape: f32[128,384], index: 2, kind: output, shape index: {}]  }
   0x1   :  { %8 = vsyncpa [#allocation6], 0 }
   0x2   :  { %9 = vsyncpa [#allocation4], 0  ;;  %s1064_s9 = smov [#allocation2]   ;;  %s1065_s11 = smov [#allocation5]  }
   0x3   :  { %s16_s10 = sshll.u32 %s1064_s9, 4  ;;  %s25_s12 = sshll.u32 %s1065_s11, 4  ;;  %s17_s10 = int_to_ptr.vmem [resolvable:$true] %s16_s10  ;;  %s1088_s12 = int_to_ptr.vmem [resolvable:$true] %s25_s12 }
   0x4   :  { %s992_s15 = scalar_lea.hbm %s1264_s0, 16 }
   0x5   :  { %p993_p0 = scmp.ne.s32.totalorder %s1264_s0, %s992_s15  ;;  %p996_p1 = scmp.lt.u32.totalorder %s992_s15, %s1264_s0 }
   0x7   :  { %p998_p2 = pnand %p996_p1, %p993_p0 }
   0x9   :  { %1001 = shalt.err (!%p998_p2)
}
   0xa   :  { %s1002_s20 = scalar_lea.vmem %s17_s10, 16  ;;  %s1006_s21 = scalar_lea.vmem %s17_s10, 32 }
   0xb   :  { %p1003_p3 = scmp.ne.s32.totalorder %s17_s10, %s1002_s20  ;;  %p1007_p4 = scmp.lt.s32.totalorder %s17_s10, %s17_s10 }
   0xc   :  { %p1008_p5 = scmp.lt.s32.totalorder %s1006_s21, %s1002_s20 }
   0xe   :  { %p1009_p6 = por %p1008_p5, %p1007_p4 }
  0x10   :  { %p1010_p7 = pnand %p1009_p6, %p1003_p3 }
  0x12   :  { %1013 = shalt.err (!%p1010_p7)
}
  0x13   :  { %19 = dma.hbm_to_vmem [thread:$0]  %s1264_s0, 16, %s17_s10, [#allocation3]  }
  0x14   :  { %s1014_s26 = scalar_lea.hbm %s1265_s1, 1536 }
  0x15   :  { %p1015_p8 = scmp.ne.s32.totalorder %s1265_s1, %s1014_s26  ;;  %p1018_p9 = scmp.lt.u32.totalorder %s1014_s26, %s1265_s1 }
  0x17   :  { %p1020_p10 = pnand %p1018_p9, %p1015_p8 }
  0x19   :  { %1023 = shalt.err (!%p1020_p10)
}
  0x1a   :  { %s1024_s3 = scalar_lea.vmem %s1088_s12, 1536  ;;  %p1029_p12 = scmp.lt.s32.totalorder %s1088_s12, %s1088_s12 }
  0x1b   :  { %p1025_p11 = scmp.ne.s32.totalorder %s1088_s12, %s1024_s3  ;;  %p1030_p13 = scmp.lt.s32.totalorder %s1024_s3, %s1024_s3 }
  0x1d   :  { %p1031_p0 = por %p1030_p13, %p1029_p12 }
  0x1f   :  { %p1032_p1 = pnand %p1031_p0, %p1025_p11 }
  0x21   :  { %1035 = shalt.err (!%p1032_p1)
}
  0x22   :  { %s1066_s0 = smov 192   ;;  %s1067_s4 = smov 12  }
  0x23   :  { %31 = dma.hbm_to_vmem [thread:$0]  %s1265_s1, 1536, %s1088_s12, [#allocation6], %s1066_s0, %s1066_s0, %s1067_s4  }
  0x24   :  { %1058 = dma.done.wait [#allocation3], 16  }
  0x25   :  { %1059 = vsyncadd [#allocation3], 4294967280 }
  0x26   :  { %1060 = dma.done.wait [#allocation6], 1536  }
  0x27   :  { %1061 = vsyncadd [#allocation6], 4294965760  ;;  %v40_v0 = vlaneseq  ;;  %v1068_v1 = vmov 0   ;;  %v774_v6 = vld [vmem:[#allocation2] ss:$0 sm:$0xff]  ;;  %v1069_v9 = vmov 0.0  }
  0x28   :  { %185 = vmatprep.mubr.bf16.mxu0 %v1068_v1  ;;  %225 = vmatprep.mubr.bf16.mxu1 %v1068_v1  ;;  %v944_v7 = vld [vmem:[#allocation5 + $0x34] ss:$12 sps:$4 sm:$0xff]   ;;  %v946_v8 = vld [vmem:[#allocation5 + $0x30] ss:$12 sps:$4 sm:$0xff]   ;;  %v947_v15 = vld [vmem:[#allocation5 + $0x4c] ss:$12 sps:$4 sm:$0xff]  }
  0x29   :  { %v41_v2 = vshrl.u32 %v40_v0, 7  ;;  %153 = vmatprep.subr.bf16.mxu0 %v944_v7  ;;  %883 = vmatprep.subr.bf16.mxu1 %v944_v7  ;;  %v949_v16 = vld [vmem:[#allocation5 + $0x48] ss:$12 sps:$4 sm:$0xff]   ;;  %v952_v18 = vld [vmem:[#allocation5 + $0x4] ss:$12 sps:$4 sm:$0xff]   ;;  %vm128_vm4 = vcmask 261120  }
  0x2a   :  { %154 = vmatpush1.bf16.msra.mxu0 %v946_v8  ;;  %885 = vmatpush1.bf16.msra.mxu1 %v946_v8  ;;  %v953_v19 = vld [vmem:[#allocation5 + $0x38] ss:$12 sps:$4 sm:$0xff]   ;;  %v950_v20 = vld [vmem:[#allocation5] ss:$12 sps:$4 sm:$0xff]   ;;  %v956_v21 = vld [vmem:[#allocation5 + $0x1c] ss:$12 sps:$4 sm:$0xff]  }
  0x2b   :  { %v42_v3 = vadd.s32 8, %v41_v2  ;;  %v43_v4 = vadd.s32 16, %v41_v2  ;;  %v44_v5 = vadd.s32 24, %v41_v2  ;;  %vm49_vm0 = vcmp.eq.s32.totalorder %v774_v6, %v41_v2  ;;  %155 = vmatprep.subr.bf16.mxu0 %v947_v15  ;;  %884 = vmatprep.subr.bf16.mxu1 %v947_v15  ;;  %v954_v23 = vld [vmem:[#allocation5 + $0x18] ss:$12 sps:$4 sm:$0xff]   ;;  %s1070_s1 = smov [#allocation7]  }
  0x2c   :  { %v775_v10 = vsel %vm49_vm0, 1.0, %v1069_v9  ;;  %v957_v27 = vld [vmem:[#allocation5 + $0x50] ss:$12 sps:$4 sm:$0xff]   ;;  %v958_v29 = vld [vmem:[#allocation5 + $0x8] ss:$12 sps:$4 sm:$0xff]   ;;  %v1193_v50 = vand.u32 127, %v40_v0 }
  0x2d   :  { %vm50_vm1 = vcmp.eq.s32.totalorder %v774_v6, %v42_v3  ;;  %vm51_vm2 = vcmp.eq.s32.totalorder %v774_v6, %v43_v4  ;;  %vm52_vm3 = vcmp.eq.s32.totalorder %v774_v6, %v44_v5  ;;  %v959_v33 = vld [vmem:[#allocation5 + $0x20] ss:$12 sps:$4 sm:$0xff]   ;;  %s761_s7 = sshll.u32 %s1070_s1, 4  ;;  %s762_s7 = int_to_ptr.vmem [resolvable:$true] %s761_s7 }
  0x2e   :  { %v776_v11 = vsel %vm50_vm1, 1.0, %v1069_v9  ;;  %v777_v12 = vsel %vm51_vm2, 1.0, %v1069_v9  ;;  %v778_v13 = vsel %vm52_vm3, 1.0, %v1069_v9  ;;  %156 = vmatpush1.bf16.msra.mxu0 %v949_v16  ;;  %886 = vmatpush1.bf16.msra.mxu1 %v949_v16  ;;  %vm657_vm5 = vcmp.lt.s32.totalorder %v1193_v50, 32  ;;  %s1036_s8 = scalar_lea.vmem %s762_s7, 6144  ;;  %p1041_p3 = scmp.lt.s32.totalorder %s762_s7, %s762_s7 }
  0x2f   :  { %v61_v14 = vpack.c.bf16 %v776_v11, %v775_v10  ;;  %v62_v17 = vpack.c.bf16 %v778_v13, %v777_v12  ;;  %395 = vmatprep.subr.bf16.mxu0 %v952_v18  ;;  %843 = vmatprep.subr.bf16.mxu1 %v953_v19  ;;  %p1037_p2 = scmp.ne.s32.totalorder %s762_s7, %s1036_s8  ;;  %p1042_p4 = scmp.lt.s32.totalorder %s1036_s8, %s1036_s8 }
  0x31   :  { %80 = vxpose.xlu0.c.b16.start [1/2] (short) %v61_v14, 128  ;;  %p1043_p5 = por %p1042_p4, %p1041_p3 }
  0x33   :  { %p1044_p6 = pnand %p1043_p5, %p1037_p2 }
  0x35   :  { %81 = vxpose.xlu0.c.b16.end [2/2] (short) %v62_v17, 128 }
  0x97   :  { %v88_v22 = vpop.trf.xlu0 }
  0x98   :  { %785 = vmatmul.mubr.msk.bf16.vlgmr.msra.gmra.mrb[0].mxu0 %vm128_vm4, %v88_v22 }
  0x99   :  { %396 = vmatpush1.bf16.msra.mxu0 %v950_v20  ;;  %195 = vmatprep.mubr.bf16.mxu0 %v1068_v1 }
  0x9a   :  { %397 = vmatprep.subr.bf16.mxu0 %v956_v21 }
  0x9b   :  { %v89_v24 = vpop.trf.xlu0 }
  0x9d   :  { %398 = vmatpush1.bf16.msra.mxu0 %v954_v23 }
  0x9f   :  { %v90_v25 = vpop.trf.xlu0 }
  0xa0   :  { %786 = vmatmul.mubr.msk.bf16.gmra.mrb[4].mxu0 %vm128_vm4, %v89_v24 }
  0xa1   :  { %205 = vmatprep.mubr.bf16.mxu0 %v1068_v1 }
  0xa3   :  { %v91_v26 = vpop.trf.xlu0 }
  0xa7   :  { %v92_v28 = vpop.trf.xlu0 }
  0xa8   :  { %787 = vmatmul.mubr.msk.bf16.gmra.mrb[8].mxu0 %vm128_vm4, %v90_v25  ;;  %789 = vmatmul.mubr.msk.bf16.vlgmr.msra.gmra.mrb[0].mxu1 %vm128_vm4, %v92_v28 }
  0xa9   :  { %844 = vmatpush3.bf16.msra.mxu1 %v953_v19  ;;  %215 = vmatprep.mubr.bf16.mxu0 %v1068_v1 }
  0xaa   :  { %235 = vmatprep.mubr.bf16.mxu1 %v1068_v1  ;;  %845 = vmatprep.subr.bf16.mxu1 %v957_v27 }
  0xab   :  { %v93_v30 = vpop.trf.xlu0 }
  0xad   :  { %846 = vmatpush3.bf16.msra.mxu1 %v957_v27 }
  0xae   :  { %863 = vmatprep.subr.bf16.mxu1 %v958_v29 }
  0xaf   :  { %v94_v31 = vpop.trf.xlu0 }
  0xb0   :  { %788 = vmatmul.mubr.msk.bf16.gmra.mrb[12].mxu0 %vm128_vm4, %v91_v26  ;;  %790 = vmatmul.mubr.msk.bf16.gmra.mrb[4].mxu1 %vm128_vm4, %v93_v30 }
  0xb1   :  { %245 = vmatprep.mubr.bf16.mxu1 %v1068_v1  ;;  %427 = vmatprep.mubr.bf16.mxu0 %v1068_v1 }
  0xb3   :  { %v95_v32 = vpop.trf.xlu0 }
  0xb8   :  { %791 = vmatmul.mubr.msk.bf16.gmra.mrb[8].mxu1 %vm128_vm4, %v94_v31  ;;  %807 = vmatmul.mubr.msk.bf16.vlgmr.msra.gmra.mrb[0].mxu0 %vm128_vm4, %v88_v22 }
  0xb9   :  { %255 = vmatprep.mubr.bf16.mxu1 %v1068_v1  ;;  %437 = vmatprep.mubr.bf16.mxu0 %v1068_v1 }
  0xc0   :  { %792 = vmatmul.mubr.msk.bf16.gmra.mrb[12].mxu1 %vm128_vm4, %v95_v32  ;;  %808 = vmatmul.mubr.msk.bf16.gmra.mrb[4].mxu0 %vm128_vm4, %v89_v24 }
  0xc1   :  { %847 = vmatprep.mubr.msk.bf16.mxu1 %vm128_vm4, %v88_v22  ;;  %447 = vmatprep.mubr.bf16.mxu0 %v1068_v1 }
  0xc8   :  { %848 = vmatmul.mubr.msk.bf16.vlgmr.msra.gmra.mrb[16].mxu1 %vm128_vm4, %v89_v24  ;;  %809 = vmatmul.mubr.msk.bf16.gmra.mrb[8].mxu0 %vm128_vm4, %v90_v25 }
  0xc9   :  { %864 = vmatpush3.bf16.msra.mxu1 %v958_v29  ;;  %851 = vmatprep.mubr.msk.bf16.mxu1 %vm128_vm4, %v90_v25 }
  0xca   :  { %457 = vmatprep.mubr.bf16.mxu0 %v1068_v1  ;;  %865 = vmatprep.subr.bf16.mxu1 %v959_v33 }
  0xcd   :  { %866 = vmatpush3.bf16.msra.mxu1 %v959_v33 }
  0xd0   :  { %852 = vmatmul.mubr.msk.bf16.gmra.mrb[20].mxu1 %vm128_vm4, %v91_v26  ;;  %810 = vmatmul.mubr.msk.bf16.gmra.mrb[12].mxu0 %vm128_vm4, %v91_v26 }
  0xd1   :  { %855 = vmatprep.mubr.msk.bf16.mxu1 %vm128_vm4, %v92_v28  ;;  %467 = vmatprep.mubr.bf16.mxu0 %v1068_v1 }
  0xd8   :  { %856 = vmatmul.mubr.msk.bf16.gmra.mrb[24].mxu1 %vm128_vm4, %v93_v30  ;;  %811 = vmatmul.mubr.msk.bf16.gmra.mrb[16].mxu0 %vm128_vm4, %v92_v28 }
  0xd9   :  { %859 = vmatprep.mubr.msk.bf16.mxu1 %vm128_vm4, %v94_v31  ;;  %477 = vmatprep.mubr.bf16.mxu0 %v1068_v1 }
  0xe0   :  { %860 = vmatmul.mubr.msk.bf16.gmra.mrb[28].mxu1 %vm128_vm4, %v95_v32  ;;  %812 = vmatmul.mubr.msk.bf16.gmra.mrb[20].mxu0 %vm128_vm4, %v93_v30 }
  0xe1   :  { %867 = vmatprep.mubr.msk.bf16.mxu1 %vm128_vm4, %v88_v22  ;;  %487 = vmatprep.mubr.bf16.mxu0 %v1068_v1 }
  0xe8   :  { %813 = vmatmul.mubr.msk.bf16.gmra.mrb[24].mxu0 %vm128_vm4, %v94_v31  ;;  %868 = vmatmul.mubr.msk.bf16.vlgmr.msra.gmra.mrb[16].mxu1 %vm128_vm4, %v89_v24 }
  0xe9   :  { %871 = vmatprep.mubr.msk.bf16.mxu1 %vm128_vm4, %v90_v25  ;;  %497 = vmatprep.mubr.bf16.mxu0 %v1068_v1 }
  0xf0   :  { %814 = vmatmul.mubr.msk.bf16.gmra.mrb[28].mxu0 %vm128_vm4, %v95_v32  ;;  %872 = vmatmul.mubr.msk.bf16.gmra.mrb[20].mxu1 %vm128_vm4, %v91_v26 }
  0xf1   :  { %875 = vmatprep.mubr.msk.bf16.mxu1 %vm128_vm4, %v92_v28 }
  0xf8   :  { %876 = vmatmul.mubr.msk.bf16.gmra.mrb[24].mxu1 %vm128_vm4, %v93_v30 }
  0xf9   :  { %879 = vmatprep.mubr.msk.bf16.mxu1 %vm128_vm4, %v94_v31 }
 0x100   :  { %880 = vmatmul.mubr.msk.bf16.gmra.mrb[28].mxu1 %vm128_vm4, %v95_v32 }
 0x17b   :  { %v1168_v34 = vpop.f32.mrb[0].mxu1 }
 0x17c   :  { %v1170_v35 = vpop.f32.mrb[1].mxu1 }
 0x17d   :  { %v1172_v36 = vpop.f32.mrb[2].mxu1 }
 0x17e   :  { %v1174_v37 = vpop.f32.mrb[3].mxu1 }
 0x183   :  { %v1176_v38 = vpop.f32.mrb[4].mxu1 }
 0x184   :  { %v1178_v39 = vpop.f32.mrb[5].mxu1 }
 0x185   :  { %v1180_v40 = vpop.f32.mrb[6].mxu1 }
 0x186   :  { %v1182_v41 = vpop.f32.mrb[7].mxu1 }
 0x18b   :  { %v1184_v42 = vpop.f32.mrb[8].mxu1  ;;  %v429_v43 = vpop.f32.mrb[0].mxu0 }
 0x18c   :  { %960 = vtanh.f32 %v429_v43  ;;  %v1186_v44 = vpop.f32.mrb[9].mxu1  ;;  %v431_v45 = vpop.f32.mrb[1].mxu0 }
 0x18d   :  { %709 = vst [vmem:[#allocation7 + $0x8] sm:$0xff] %v431_v45  ;;  %v1188_v46 = vpop.f32.mrb[10].mxu1  ;;  %v433_v47 = vpop.f32.mrb[2].mxu0 }
 0x18e   :  { %962 = vtanh.f32 %v433_v47  ;;  %v1190_v48 = vpop.f32.mrb[11].mxu1  ;;  %v435_v49 = vpop.f32.mrb[3].mxu0 }
 0x18f   :  { %712 = vst [vmem:[#allocation7 + $0x20] sm:$0xff] %v435_v49 }
 0x193   :  { %v1195_v51 = vpop.f32.mrb[12].mxu1  ;;  %v439_v52 = vpop.f32.mrb[4].mxu0 }
 0x194   :  { %964 = vtanh.f32 %v439_v52  ;;  %v1198_v53 = vpop.f32.mrb[13].mxu1  ;;  %v441_v54 = vpop.f32.mrb[5].mxu0 }
 0x195   :  { %715 = vst [vmem:[#allocation7 + $0x38] sm:$0xff] %v441_v54  ;;  %v1200_v55 = vpop.f32.mrb[14].mxu1  ;;  %v443_v56 = vpop.f32.mrb[6].mxu0 }
 0x196   :  { %v961_v57 = vpop.eup %960  ;;  %966 = vtanh.f32 %v443_v56  ;;  %v1202_v58 = vpop.f32.mrb[15].mxu1 }
 0x197   :  { %v445_v59 = vpop.f32.mrb[7].mxu0  ;;  %v660_v60 = vsel %vm657_vm5, %v961_v57, %v429_v43 }
 0x198   :  { %718 = vst [vmem:[#allocation7 + $0x50] sm:$0xff] %v445_v59  ;;  %v963_v61 = vpop.eup %962  ;;  %708 = vst [vmem:[#allocation7] sm:$0xff] %v660_v60 }
 0x199   :  { %v663_v62 = vsel %vm657_vm5, %v963_v61, %v433_v47 }
 0x19a   :  { %711 = vst [vmem:[#allocation7 + $0x18] sm:$0xff] %v663_v62 }
 0x19b   :  { %v449_v63 = vpop.f32.mrb[8].mxu0 }
 0x19c   :  { %968 = vtanh.f32 %v449_v63  ;;  %v451_v0 = vpop.f32.mrb[9].mxu0 }
 0x19d   :  { %721 = vst [vmem:[#allocation7 + $0x68] sm:$0xff] %v451_v0  ;;  %v453_v1 = vpop.f32.mrb[10].mxu0 }
 0x19e   :  { %v965_v2 = vpop.eup %964  ;;  %970 = vtanh.f32 %v453_v1  ;;  %v455_v3 = vpop.f32.mrb[11].mxu0 }
 0x19f   :  { %v666_v4 = vsel %vm657_vm5, %v965_v2, %v439_v52  ;;  %724 = vst [vmem:[#allocation7 + $0x80] sm:$0xff] %v455_v3 }
 0x1a0   :  { %v967_v5 = vpop.eup %966  ;;  %714 = vst [vmem:[#allocation7 + $0x30] sm:$0xff] %v666_v4 }
 0x1a1   :  { %v669_v6 = vsel %vm657_vm5, %v967_v5, %v443_v56 }
 0x1a2   :  { %717 = vst [vmem:[#allocation7 + $0x48] sm:$0xff] %v669_v6 }
 0x1a3   :  { %v459_v7 = vpop.f32.mrb[12].mxu0 }
 0x1a4   :  { %972 = vtanh.f32 %v459_v7  ;;  %v461_v8 = vpop.f32.mrb[13].mxu0 }
 0x1a5   :  { %727 = vst [vmem:[#allocation7 + $0x98] sm:$0xff] %v461_v8  ;;  %v463_v9 = vpop.f32.mrb[14].mxu0 }
 0x1a6   :  { %v969_v10 = vpop.eup %968  ;;  %974 = vtanh.f32 %v463_v9  ;;  %v465_v11 = vpop.f32.mrb[15].mxu0 }
 0x1a7   :  { %v672_v12 = vsel %vm657_vm5, %v969_v10, %v449_v63  ;;  %730 = vst [vmem:[#allocation7 + $0xb0] sm:$0xff] %v465_v11 }
 0x1a8   :  { %v971_v13 = vpop.eup %970  ;;  %720 = vst [vmem:[#allocation7 + $0x60] sm:$0xff] %v672_v12 }
 0x1a9   :  { %v675_v14 = vsel %vm657_vm5, %v971_v13, %v453_v1 }
 0x1aa   :  { %723 = vst [vmem:[#allocation7 + $0x78] sm:$0xff] %v675_v14 }
 0x1ab   :  { %v469_v15 = vpop.f32.mrb[16].mxu0 }
 0x1ac   :  { %v470_v16 = vadd.f32 %v469_v15, %v1168_v34  ;;  %v471_v17 = vpop.f32.mrb[17].mxu0 }
 0x1ad   :  { %v472_v18 = vadd.f32 %v471_v17, %v1170_v35  ;;  %v473_v19 = vpop.f32.mrb[18].mxu0 }
 0x1ae   :  { %v973_v20 = vpop.eup %972  ;;  %976 = vtanh.f32 %v470_v16  ;;  %v474_v21 = vadd.f32 %v473_v19, %v1172_v36  ;;  %v475_v22 = vpop.f32.mrb[19].mxu0 }
 0x1af   :  { %v678_v23 = vsel %vm657_vm5, %v973_v20, %v459_v7  ;;  %733 = vst [vmem:[#allocation7 + $0xc8] sm:$0xff] %v472_v18  ;;  %v476_v24 = vadd.f32 %v475_v22, %v1174_v37 }
 0x1b0   :  { %v975_v25 = vpop.eup %974  ;;  %726 = vst [vmem:[#allocation7 + $0x90] sm:$0xff] %v678_v23  ;;  %978 = vtanh.f32 %v474_v21 }
 0x1b1   :  { %v681_v26 = vsel %vm657_vm5, %v975_v25, %v463_v9  ;;  %736 = vst [vmem:[#allocation7 + $0xe0] sm:$0xff] %v476_v24 }
 0x1b2   :  { %729 = vst [vmem:[#allocation7 + $0xa8] sm:$0xff] %v681_v26 }
 0x1b3   :  { %v479_v27 = vpop.f32.mrb[20].mxu0 }
 0x1b4   :  { %v480_v28 = vadd.f32 %v479_v27, %v1176_v38  ;;  %v481_v29 = vpop.f32.mrb[21].mxu0 }
 0x1b5   :  { %v482_v30 = vadd.f32 %v481_v29, %v1178_v39  ;;  %v483_v31 = vpop.f32.mrb[22].mxu0 }
 0x1b6   :  { %980 = vtanh.f32 %v480_v28  ;;  %v484_v32 = vadd.f32 %v483_v31, %v1180_v40  ;;  %v485_v33 = vpop.f32.mrb[23].mxu0 }
 0x1b7   :  { %739 = vst [vmem:[#allocation7 + $0xf8] sm:$0xff] %v482_v30  ;;  %v486_v34 = vadd.f32 %v485_v33, %v1182_v41 }
 0x1b8   :  { %v977_v35 = vpop.eup %976  ;;  %982 = vtanh.f32 %v484_v32 }
 0x1b9   :  { %v684_v36 = vsel %vm657_vm5, %v977_v35, %v470_v16  ;;  %742 = vst [vmem:[#allocation7 + $0x110] sm:$0xff] %v486_v34 }
 0x1ba   :  { %v979_v37 = vpop.eup %978  ;;  %732 = vst [vmem:[#allocation7 + $0xc0] sm:$0xff] %v684_v36 }
 0x1bb   :  { %v687_v38 = vsel %vm657_vm5, %v979_v37, %v474_v21  ;;  %v489_v39 = vpop.f32.mrb[24].mxu0  ;;  %v869_v43 = vpop.f32.mrb[16].mxu1 }
 0x1bc   :  { %735 = vst [vmem:[#allocation7 + $0xd8] sm:$0xff] %v687_v38  ;;  %v490_v40 = vadd.f32 %v489_v39, %v1184_v42  ;;  %716 = vst [vmem:[#allocation7 + $0x40] sm:$0xff] %v869_v43  ;;  %v491_v45 = vpop.f32.mrb[25].mxu0  ;;  %v542_v47 = vpop.f32.mrb[17].mxu1 }
 0x1bd   :  { %v492_v41 = vadd.f32 %v491_v45, %v1186_v44  ;;  %710 = vst [vmem:[#allocation7 + $0x10] sm:$0xff] %v542_v47  ;;  %v493_v49 = vpop.f32.mrb[26].mxu0  ;;  %v870_v52 = vpop.f32.mrb[18].mxu1 }
 0x1be   :  { %984 = vtanh.f32 %v490_v40  ;;  %v494_v54 = vadd.f32 %v493_v49, %v1188_v46  ;;  %719 = vst [vmem:[#allocation7 + $0x58] sm:$0xff] %v870_v52  ;;  %v495_v56 = vpop.f32.mrb[27].mxu0  ;;  %v545_v57 = vpop.f32.mrb[19].mxu1 }
 0x1bf   :  { %745 = vst [vmem:[#allocation7 + $0x128] sm:$0xff] %v492_v41  ;;  %v496_v59 = vadd.f32 %v495_v56, %v1190_v48  ;;  %713 = vst [vmem:[#allocation7 + $0x28] sm:$0xff] %v545_v57 }
 0x1c0   :  { %v981_v60 = vpop.eup %980  ;;  %986 = vtanh.f32 %v494_v54 }
 0x1c1   :  { %v690_v42 = vsel %vm657_vm5, %v981_v60, %v480_v28  ;;  %748 = vst [vmem:[#allocation7 + $0x140] sm:$0xff] %v496_v59 }
 0x1c2   :  { %v983_v44 = vpop.eup %982  ;;  %738 = vst [vmem:[#allocation7 + $0xf0] sm:$0xff] %v690_v42 }
 0x1c3   :  { %v693_v61 = vsel %vm657_vm5, %v983_v44, %v484_v32  ;;  %v499_v62 = vpop.f32.mrb[28].mxu0  ;;  %v873_v46 = vpop.f32.mrb[20].mxu1 }
 0x1c4   :  { %741 = vst [vmem:[#allocation7 + $0x108] sm:$0xff] %v693_v61  ;;  %v500_v63 = vadd.f32 %v499_v62, %v1195_v51  ;;  %728 = vst [vmem:[#allocation7 + $0xa0] sm:$0xff] %v873_v46  ;;  %v501_v0 = vpop.f32.mrb[29].mxu0  ;;  %v558_v48 = vpop.f32.mrb[21].mxu1 }
 0x1c5   :  { %v502_v1 = vadd.f32 %v501_v0, %v1198_v53  ;;  %722 = vst [vmem:[#allocation7 + $0x70] sm:$0xff] %v558_v48  ;;  %v503_v2 = vpop.f32.mrb[30].mxu0  ;;  %v874_v3 = vpop.f32.mrb[22].mxu1 }
 0x1c6   :  { %988 = vtanh.f32 %v500_v63  ;;  %v504_v4 = vadd.f32 %v503_v2, %v1200_v55  ;;  %731 = vst [vmem:[#allocation7 + $0xb8] sm:$0xff] %v874_v3  ;;  %v505_v5 = vpop.f32.mrb[31].mxu0  ;;  %v561_v6 = vpop.f32.mrb[23].mxu1 }
 0x1c7   :  { %751 = vst [vmem:[#allocation7 + $0x158] sm:$0xff] %v502_v1  ;;  %v506_v7 = vadd.f32 %v505_v5, %v1202_v58  ;;  %725 = vst [vmem:[#allocation7 + $0x88] sm:$0xff] %v561_v6 }
 0x1c8   :  { %v985_v8 = vpop.eup %984  ;;  %990 = vtanh.f32 %v504_v4 }
 0x1c9   :  { %v696_v51 = vsel %vm657_vm5, %v985_v8, %v490_v40  ;;  %754 = vst [vmem:[#allocation7 + $0x170] sm:$0xff] %v506_v7 }
 0x1ca   :  { %v987_v53 = vpop.eup %986  ;;  %744 = vst [vmem:[#allocation7 + $0x120] sm:$0xff] %v696_v51 }
 0x1cb   :  { %v699_v9 = vsel %vm657_vm5, %v987_v53, %v494_v54  ;;  %v877_v10 = vpop.f32.mrb[24].mxu1 }
 0x1cc   :  { %747 = vst [vmem:[#allocation7 + $0x138] sm:$0xff] %v699_v9  ;;  %740 = vst [vmem:[#allocation7 + $0x100] sm:$0xff] %v877_v10  ;;  %v574_v55 = vpop.f32.mrb[25].mxu1 }
 0x1cd   :  { %734 = vst [vmem:[#allocation7 + $0xd0] sm:$0xff] %v574_v55  ;;  %v878_v11 = vpop.f32.mrb[26].mxu1 }
 0x1ce   :  { %743 = vst [vmem:[#allocation7 + $0x118] sm:$0xff] %v878_v11  ;;  %v577_v58 = vpop.f32.mrb[27].mxu1 }
 0x1cf   :  { %737 = vst [vmem:[#allocation7 + $0xe8] sm:$0xff] %v577_v58 }
 0x1d0   :  { %v989_v12 = vpop.eup %988 }
 0x1d1   :  { %v702_v13 = vsel %vm657_vm5, %v989_v12, %v500_v63 }
 0x1d2   :  { %v991_v14 = vpop.eup %990  ;;  %750 = vst [vmem:[#allocation7 + $0x150] sm:$0xff] %v702_v13 }
 0x1d3   :  { %v705_v15 = vsel %vm657_vm5, %v991_v14, %v504_v4  ;;  %v881_v16 = vpop.f32.mrb[28].mxu1 }
 0x1d4   :  { %753 = vst [vmem:[#allocation7 + $0x168] sm:$0xff] %v705_v15  ;;  %752 = vst [vmem:[#allocation7 + $0x160] sm:$0xff] %v881_v16  ;;  %v590_v17 = vpop.f32.mrb[29].mxu1 }
 0x1d5   :  { %746 = vst [vmem:[#allocation7 + $0x130] sm:$0xff] %v590_v17  ;;  %v882_v18 = vpop.f32.mrb[30].mxu1 }
 0x1d6   :  { %755 = vst [vmem:[#allocation7 + $0x178] sm:$0xff] %v882_v18  ;;  %v593_v19 = vpop.f32.mrb[31].mxu1 }
 0x1d7   :  { %749 = vst [vmem:[#allocation7 + $0x148] sm:$0xff] %v593_v19 }
 0x1d8   :  { %1047 = shalt.err (!%p1044_p6)
}
 0x1d9   :  { %s1048_s11 = scalar_lea.hbm %s1266_s2, 6144 }
 0x1da   :  { %p1049_p7 = scmp.ne.s32.totalorder %s1266_s2, %s1048_s11  ;;  %p1052_p8 = scmp.lt.u32.totalorder %s1048_s11, %s1266_s2 }
 0x1dc   :  { %p1054_p9 = pnand %p1052_p8, %p1049_p7 }
 0x1de   :  { %1057 = shalt.err (!%p1054_p9)
}
 0x1df   :  { %s1071_s16 = smov 384   ;;  %s1072_s17 = smov 24  }
 0x1e0   :  { %767 = dma.vmem_to_hbm [thread:$0]  %s762_s7, 6144, %s1266_s2, [#allocation4], %s1071_s16, %s1071_s16, %s1072_s17  }
 0x1e1   :  { %1062 = dma.done.wait [#allocation4], 6144  }
 0x1e2   :  { %1063 = vsyncadd [#allocation4], 4294961152 }
 0x1e3   :  { %771 = vsyncpa [#allocation3], 1 }
 0x1e4   :  { %772 = vsyncpa [#allocation6], 1 }
 0x1e5   :  { %773 = vsyncpa [#allocation4], 1 }

</bundles_post_ra>
